<compile_context>
chip_gen: v7x
topology: tpu7x:2x2x1
jax: 0.10.0
libtpu: 0.0.40
codegen_flags: <defaults>
</compile_context>

<pallas_src>
import functools

import jax
import jax.numpy as jnp
from jax.experimental import pallas as pl
from jax.experimental.pallas import tpu as pltpu

IN_DIM = 28 * 28   # 784
H1 = 128
H2 = 64
H2_PAD = 128       # fc2 output / fc3 input padded -> every intermediate lane-dense
OUT_DIM = 10
OUT_PAD = 128      # fc3 output padded to a lane-dense width (unmasked vst)

# Cap on the batch tile: double-buffered f32 x at tb=1024 is ~6.4 MB, safely
# inside v5e's 16 MiB default scoped VMEM (v6e/v7x have 32 MiB scoped).
MAX_TB = 1024


def mlp_kernel(x_ref, w1_ref, b1_ref, w2_ref, b2_ref, w3_ref, b3_ref, o_ref):
    # x_ref: [TB, 784] f32; w*: bf16; b*: f32 (padded); o_ref: [TB, 128] bf16.
    # Cast activations to bf16 in-kernel right before the MXU feed; bias-add /
    # ReLU stay in f32 (v5e VPU has no bf16 ALU).
    x = x_ref[...].astype(jnp.bfloat16)

    # fc1 + ReLU  (bf16 x bf16 -> f32 accumulate on the MXU)
    h1 = jnp.dot(x, w1_ref[...], preferred_element_type=jnp.float32) + b1_ref[...]
    h1 = jnp.maximum(h1, 0.0)

    # fc2 + ReLU (columns 64..127 are zero weights + zero bias -> stay exactly 0)
    h2 = jnp.dot(h1.astype(jnp.bfloat16), w2_ref[...],
                 preferred_element_type=jnp.float32) + b2_ref[...]
    h2 = jnp.maximum(h2, 0.0)

    # fc3 (output columns 10..127 are zero-padded weights; sliced off in wrapper)
    o = jnp.dot(h2.astype(jnp.bfloat16), w3_ref[...],
                preferred_element_type=jnp.float32) + b3_ref[...]
    o_ref[...] = o.astype(o_ref.dtype)


def _round_up(n, m):
    return ((n + m - 1) // m) * m


@functools.partial(jax.jit, static_argnames=("tb",))
def net_forward(x, packed_params, tb=512):
    """x: [B, 1, 28, 28] or [B, 784] float. Returns logits [B, 10] float32.

    packed_params: output of prepare_params() (bf16 weights, f32 biases,
    fc2/fc3 padded to 128 features)."""
    w1, b1, w2, b2, w3, b3 = packed_params
    B = x.shape[0]
    x2d = x.reshape(B, IN_DIM).astype(jnp.float32)   # glue: x.view(-1, 784); stays f32

    # --- batch-tile selection (multiple of 16 for bf16 output sublane packing) ---
    tb = max(16, min(tb, MAX_TB))
    tb = min(tb, _round_up(B, 16))                   # don't over-pad tiny batches
    if _round_up(B, 16) >= 32:
        # Keep at least 2 batch tiles so v7x's two TensorCores both get work,
        # and size the tile off cdiv(B, 2) to keep padding waste small.
        tb = min(tb, _round_up(pl.cdiv(B, 2), 16))
    B_pad = _round_up(B, tb)
    if B_pad != B:
        x2d = jnp.pad(x2d, ((0, B_pad - B), (0, 0)))

    grid = (B_pad // tb,)

    n_weight = IN_DIM * H1 + H1 * H2_PAD + H2_PAD * OUT_PAD
    cost = pl.CostEstimate(
        flops=2 * B_pad * n_weight,
        transcendentals=0,
        bytes_accessed=(B_pad * IN_DIM * 4               # f32 activations in
                        + n_weight * 2                   # bf16 weights
                        + (H1 + H2_PAD + OUT_PAD) * 4    # f32 biases
                        + B_pad * OUT_PAD * 2),          # bf16 padded logits out
    )

    out = pl.pallas_call(
        mlp_kernel,
        out_shape=jax.ShapeDtypeStruct((B_pad, OUT_PAD), jnp.bfloat16),
        grid_spec=pltpu.PrefetchScalarGridSpec(
            num_scalar_prefetch=0,
            grid=grid,
            in_specs=[
                # activations: tiled over the batch grid axis (f32, cast in-kernel)
                pl.BlockSpec((tb, IN_DIM), lambda i: (i, 0)),
                # weights / biases: constant block index -> VMEM-resident across tiles
                pl.BlockSpec((IN_DIM, H1),      lambda i: (0, 0)),
                pl.BlockSpec((1, H1),           lambda i: (0, 0)),
                pl.BlockSpec((H1, H2_PAD),      lambda i: (0, 0)),
                pl.BlockSpec((1, H2_PAD),       lambda i: (0, 0)),
                pl.BlockSpec((H2_PAD, OUT_PAD), lambda i: (0, 0)),
                pl.BlockSpec((1, OUT_PAD),      lambda i: (0, 0)),
            ],
            out_specs=pl.BlockSpec((tb, OUT_PAD), lambda i: (i, 0)),
        ),
        compiler_params=pltpu.CompilerParams(
            # v7x: shard batch tiles across both TensorCores; harmless on v5e/v6e.
            dimension_semantics=("parallel",),
        ),
        cost_estimate=cost,
    )(x2d, w1, b1, w2, b2, w3, b3)

    return out[:B, :OUT_DIM].astype(jnp.float32)


def init_params(key):
    """Deterministic init mirroring PyTorch nn.Linear default:
    U(-1/sqrt(fan_in), 1/sqrt(fan_in)) for weights and biases. f32, [in, out]."""
    dims = [(IN_DIM, H1), (H1, H2), (H2, OUT_DIM)]
    params = []
    for fan_in, fan_out in dims:
        key, kw, kb = jax.random.split(key, 3)
        bound = 1.0 / jnp.sqrt(float(fan_in))
        w = jax.random.uniform(kw, (fan_in, fan_out), jnp.float32, -bound, bound)
        b = jax.random.uniform(kb, (1, fan_out), jnp.float32, -bound, bound)
        params += [w, b]
    return tuple(params)


def prepare_params(params):
    """Pack f32 PyTorch-layout params into kernel form:
    bf16 weights, f32 biases, fc2 zero-padded 64 -> 128 output features,
    fc3 zero-padded to 128 input and 128 output features (lane-dense)."""
    w1, b1, w2, b2, w3, b3 = params
    w2p = jnp.pad(w2, ((0, 0), (0, H2_PAD - H2)))
    b2p = jnp.pad(b2, ((0, 0), (0, H2_PAD - H2)))
    w3p = jnp.pad(w3, ((0, H2_PAD - H2), (0, OUT_PAD - OUT_DIM)))
    b3p = jnp.pad(b3, ((0, 0), (0, OUT_PAD - OUT_DIM)))
    return (
        w1.astype(jnp.bfloat16),  b1.astype(jnp.float32),
        w2p.astype(jnp.bfloat16), b2p.astype(jnp.float32),
        w3p.astype(jnp.bfloat16), b3p.astype(jnp.float32),
    )


if __name__ == "__main__":
    key = jax.random.PRNGKey(0)
    key, kx = jax.random.split(key)

    params = init_params(key)
    packed = prepare_params(params)

    # Small MNIST-like batch: [B, 1, 28, 28]
    B = 2
    x = jax.random.normal(kx, (B, 1, 28, 28), jnp.float32)

    logits = net_forward(x, packed)
    jax.block_until_ready(logits)

    # Pure-JAX reference replicating the kernel's exact rounding behaviour
    # (bf16 MXU inputs, f32 accumulate, bf16 store of the logits).
    w1p, b1p, w2p, b2p, w3p, b3p = packed
    xr = x.reshape(B, IN_DIM).astype(jnp.float32)
    h1 = jnp.maximum(jnp.dot(xr.astype(jnp.bfloat16), w1p,
                             preferred_element_type=jnp.float32) + b1p, 0.0)
    h2 = jnp.maximum(jnp.dot(h1.astype(jnp.bfloat16), w2p,
                             preferred_element_type=jnp.float32) + b2p, 0.0)
    ref_pad = jnp.dot(h2.astype(jnp.bfloat16), w3p,
                      preferred_element_type=jnp.float32) + b3p
    ref = ref_pad[:, :OUT_DIM].astype(jnp.bfloat16).astype(jnp.float32)

    assert logits.shape == (B, OUT_DIM)
    assert jnp.allclose(logits, ref, atol=1e-2, rtol=1e-2), float(
        jnp.max(jnp.abs(logits - ref)))

    print("KERNEL_OK")
</pallas_src>

<mosaic_0001>
module attributes {stable_mosaic.version = 11 : i64} {
  func.func @mlp_kernel(%arg0: i32, %arg1: memref<16x784xf32, #tpu.memory_space<vmem>>, %arg2: memref<784x128xbf16, #tpu.memory_space<vmem>>, %arg3: memref<1x128xf32, #tpu.memory_space<vmem>>, %arg4: memref<128x128xbf16, #tpu.memory_space<vmem>>, %arg5: memref<1x128xf32, #tpu.memory_space<vmem>>, %arg6: memref<128x128xbf16, #tpu.memory_space<vmem>>, %arg7: memref<1x128xf32, #tpu.memory_space<vmem>>, %arg8: memref<16x128xbf16, #tpu.memory_space<vmem>>) attributes {dimension_semantics = [#tpu.dimension_semantics<parallel>], iteration_bounds = array<i64: 1>, scalar_prefetch = 0 : i64, scratch_operands = 0 : i64, tpu.core_type = #tpu.core_type<tc>, window_params = [{transform_indices = @transform_0, window_bounds = array<i64: 16, 784>}, {pipeline_mode = #tpu.pipeline_mode<synchronous>, transform_indices = @transform_1, window_bounds = array<i64: 784, 128>}, {pipeline_mode = #tpu.pipeline_mode<synchronous>, transform_indices = @transform_2, window_bounds = array<i64: 1, 128>}, {pipeline_mode = #tpu.pipeline_mode<synchronous>, transform_indices = @transform_3, window_bounds = array<i64: 128, 128>}, {pipeline_mode = #tpu.pipeline_mode<synchronous>, transform_indices = @transform_4, window_bounds = array<i64: 1, 128>}, {pipeline_mode = #tpu.pipeline_mode<synchronous>, transform_indices = @transform_5, window_bounds = array<i64: 128, 128>}, {pipeline_mode = #tpu.pipeline_mode<synchronous>, transform_indices = @transform_6, window_bounds = array<i64: 1, 128>}, {transform_indices = @transform_7, window_bounds = array<i64: 16, 128>}]} {
    %c0 = arith.constant 0 : index
    %c0_0 = arith.constant 0 : index
    %0 = vector.load %arg1[%c0, %c0_0] : memref<16x784xf32, #tpu.memory_space<vmem>>, vector<16x784xf32>
    %1 = arith.truncf %0 : vector<16x784xf32> to vector<16x784xbf16>
    %c0_1 = arith.constant 0 : index
    %c0_2 = arith.constant 0 : index
    %2 = vector.load %arg2[%c0_1, %c0_2] : memref<784x128xbf16, #tpu.memory_space<vmem>>, vector<784x128xbf16>
    %cst = arith.constant dense<0.000000e+00> : vector<16x128xf32>
    %3 = tpu.matmul %1, %2, %cst {dimension_numbers = #tpu.dot_dimension_numbers<[1], [0], [0], [1], [0, 0, 1, 1], [], []>} : vector<16x784xbf16>, vector<784x128xbf16>, vector<16x128xf32> -> vector<16x128xf32>
    %c0_3 = arith.constant 0 : index
    %c0_4 = arith.constant 0 : index
    %4 = vector.load %arg3[%c0_3, %c0_4] : memref<1x128xf32, #tpu.memory_space<vmem>>, vector<1x128xf32>
    %5 = vector.broadcast %4 : vector<1x128xf32> to vector<16x128xf32>
    %6 = arith.addf %3, %5 : vector<16x128xf32>
    %cst_5 = arith.constant 0.000000e+00 : f32
    %7 = vector.broadcast %cst_5 : f32 to vector<16x128xf32>
    %8 = arith.maximumf %6, %7 : vector<16x128xf32>
    %9 = arith.truncf %8 : vector<16x128xf32> to vector<16x128xbf16>
    %c0_6 = arith.constant 0 : index
    %c0_7 = arith.constant 0 : index
    %10 = vector.load %arg4[%c0_6, %c0_7] : memref<128x128xbf16, #tpu.memory_space<vmem>>, vector<128x128xbf16>
    %cst_8 = arith.constant dense<0.000000e+00> : vector<16x128xf32>
    %11 = tpu.matmul %9, %10, %cst_8 {dimension_numbers = #tpu.dot_dimension_numbers<[1], [0], [0], [1], [0, 0, 1, 1], [], []>} : vector<16x128xbf16>, vector<128x128xbf16>, vector<16x128xf32> -> vector<16x128xf32>
    %c0_9 = arith.constant 0 : index
    %c0_10 = arith.constant 0 : index
    %12 = vector.load %arg5[%c0_9, %c0_10] : memref<1x128xf32, #tpu.memory_space<vmem>>, vector<1x128xf32>
    %13 = vector.broadcast %12 : vector<1x128xf32> to vector<16x128xf32>
    %14 = arith.addf %11, %13 : vector<16x128xf32>
    %cst_11 = arith.constant 0.000000e+00 : f32
    %15 = vector.broadcast %cst_11 : f32 to vector<16x128xf32>
    %16 = arith.maximumf %14, %15 : vector<16x128xf32>
    %17 = arith.truncf %16 : vector<16x128xf32> to vector<16x128xbf16>
    %c0_12 = arith.constant 0 : index
    %c0_13 = arith.constant 0 : index
    %18 = vector.load %arg6[%c0_12, %c0_13] : memref<128x128xbf16, #tpu.memory_space<vmem>>, vector<128x128xbf16>
    %cst_14 = arith.constant dense<0.000000e+00> : vector<16x128xf32>
    %19 = tpu.matmul %17, %18, %cst_14 {dimension_numbers = #tpu.dot_dimension_numbers<[1], [0], [0], [1], [0, 0, 1, 1], [], []>} : vector<16x128xbf16>, vector<128x128xbf16>, vector<16x128xf32> -> vector<16x128xf32>
    %c0_15 = arith.constant 0 : index
    %c0_16 = arith.constant 0 : index
    %20 = vector.load %arg7[%c0_15, %c0_16] : memref<1x128xf32, #tpu.memory_space<vmem>>, vector<1x128xf32>
    %21 = vector.broadcast %20 : vector<1x128xf32> to vector<16x128xf32>
    %22 = arith.addf %19, %21 : vector<16x128xf32>
    %23 = arith.truncf %22 : vector<16x128xf32> to vector<16x128xbf16>
    %c0_17 = arith.constant 0 : index
    %c0_18 = arith.constant 0 : index
    %24 = vector.load %arg8[%c0_17, %c0_18] : memref<16x128xbf16, #tpu.memory_space<vmem>>, vector<16x128xbf16>
    tpu.vector_store %arg8[%c0_17, %c0_18], %23 {strides = array<i32>} : memref<16x128xbf16, #tpu.memory_space<vmem>>, vector<16x128xbf16>,
    return
  }
  func.func @transform_0(%arg0: i32) -> (i32, i32) {
    %c0_i32 = arith.constant 0 : i32
    %c0_i32_0 = arith.constant 0 : i32
    return %arg0, %c0_i32 : i32, i32
  }
  func.func @transform_1(%arg0: i32) -> (i32, i32) {
    %c0_i32 = arith.constant 0 : i32
    %c0_i32_0 = arith.constant 0 : i32
    %c0_i32_1 = arith.constant 0 : i32
    return %c0_i32, %c0_i32_0 : i32, i32
  }
  func.func @transform_2(%arg0: i32) -> (i32, i32) {
    %c0_i32 = arith.constant 0 : i32
    %c0_i32_0 = arith.constant 0 : i32
    %c0_i32_1 = arith.constant 0 : i32
    return %c0_i32, %c0_i32_0 : i32, i32
  }
  func.func @transform_3(%arg0: i32) -> (i32, i32) {
    %c0_i32 = arith.constant 0 : i32
    %c0_i32_0 = arith.constant 0 : i32
    %c0_i32_1 = arith.constant 0 : i32
    return %c0_i32, %c0_i32_0 : i32, i32
  }
  func.func @transform_4(%arg0: i32) -> (i32, i32) {
    %c0_i32 = arith.constant 0 : i32
    %c0_i32_0 = arith.constant 0 : i32
    %c0_i32_1 = arith.constant 0 : i32
    return %c0_i32, %c0_i32_0 : i32, i32
  }
  func.func @transform_5(%arg0: i32) -> (i32, i32) {
    %c0_i32 = arith.constant 0 : i32
    %c0_i32_0 = arith.constant 0 : i32
    %c0_i32_1 = arith.constant 0 : i32
    return %c0_i32, %c0_i32_0 : i32, i32
  }
  func.func @transform_6(%arg0: i32) -> (i32, i32) {
    %c0_i32 = arith.constant 0 : i32
    %c0_i32_0 = arith.constant 0 : i32
    %c0_i32_1 = arith.constant 0 : i32
    return %c0_i32, %c0_i32_0 : i32, i32
  }
  func.func @transform_7(%arg0: i32) -> (i32, i32) {
    %c0_i32 = arith.constant 0 : i32
    %c0_i32_0 = arith.constant 0 : i32
    return %arg0, %c0_i32 : i32, i32
  }
}

</mosaic_0001>

<bundles_post_ra>
// kernel: net_forward.1
= control target key start
LH: loop header
LB: loop body
LE: loop exit
PB: predicated region body
PF: predicated region fallthrough
CT: control target
= control target key end

     0   :  { %12 = vsyncpa [#allocation3], 0  ;;  %s1178_s24 = smov [#allocation2]   ;;  %s1360_s0 = inlined_call_operand.vmem [shape: f32[16,784], index: 0, kind: input, shape index: {}]   ;;  %s1361_s1 = inlined_call_operand.hbm [shape: bf16[784,128], index: 1, kind: input, shape index: {}]   ;;  %s1362_s2 = inlined_call_operand.vmem [shape: f32[1,128], index: 2, kind: input, shape index: {}]   ;;  %s1363_s3 = inlined_call_operand.vmem [shape: bf16[128,128], index: 3, kind: input, shape index: {}]   ;;  %s1364_s4 = inlined_call_operand.vmem [shape: f32[1,128], index: 4, kind: input, shape index: {}]   ;;  %s1365_s5 = inlined_call_operand.vmem [shape: bf16[128,128], index: 5, kind: input, shape index: {}]   ;;  %s1366_s6 = inlined_call_operand.vmem [shape: f32[1,128], index: 6, kind: input, shape index: {}]   ;;  %s1367_s7 = inlined_call_operand.vmem [shape: bf16[16,128], index: 7, kind: output, shape index: {}]  }
   0x1   :  { %s20_s25 = sshll.u32 %s1178_s24, 4  ;;  %s1154_s28 = scalar_lea.hbm %s1361_s1, 6272  ;;  %s21_s25 = int_to_ptr.vmem [resolvable:$true] %s20_s25 }
   0x2   :  { %p1155_p0 = scmp.ne.s32.totalorder %s1361_s1, %s1154_s28  ;;  %p1158_p1 = scmp.lt.u32.totalorder %s1154_s28, %s1361_s1 }
   0x4   :  { %p1160_p2 = pnand %p1158_p1, %p1155_p0 }
   0x6   :  { %1163 = shalt.err (!%p1160_p2)
}
   0x7   :  { %s1164_s10 = scalar_lea.vmem %s21_s25, 6272  ;;  %p1169_p4 = scmp.lt.s32.totalorder %s21_s25, %s21_s25 }
   0x8   :  { %p1165_p3 = scmp.ne.s32.totalorder %s21_s25, %s1164_s10  ;;  %p1170_p5 = scmp.lt.s32.totalorder %s1164_s10, %s1164_s10 }
   0xa   :  { %p1171_p6 = por %p1170_p5, %p1169_p4 }
   0xc   :  { %p1172_p7 = pnand %p1171_p6, %p1165_p3 }
   0xe   :  { %1175 = shalt.err (!%p1172_p7)
}
   0xf   :  { %s1179_s11 = smov 64   ;;  %s1180_s12 = smov 4  }
  0x10   :  { %26 = dma.hbm_to_vmem [thread:$0]  %s1361_s1, 6272, %s21_s25, [#allocation3], %s1179_s11, %s1179_s11, %s1180_s12  }
  0x11   :  { %1176 = dma.done.wait [#allocation3], 6272  }
  0x12   :  { %1177 = vsyncadd [#allocation3], 4294961024  ;;  %v1089_v0 = vld [vmem:[#allocation2 + $0x40] sm:$0xff]   ;;  %v1093_v4 = vld [vmem:[#allocation2 + $0x48] sm:$0xff]   ;;  %v1181_v43 = vmov 0.0   ;;  %vm1182_vm0 = vmmov 0  }
  0x13   :  { %v1090_v1 = vld [vmem:[#allocation2] sm:$0xff]   ;;  %952 = vmatprep.subr.bf16.mxu0 %v1089_v0  ;;  %v1094_v5 = vld [vmem:[#allocation2 + $0x8] sm:$0xff]   ;;  %v1097_v8 = vld [vmem:[#allocation2 + $0x50] sm:$0xff]   ;;  %vm461_vm1 = vcmask 130048  }
  0x14   :  { %v1091_v2 = vld [vmem:[#allocation2 + $0xc0] sm:$0xff]   ;;  %953 = vmatpush3.bf16.msra.mxu0 %v1090_v1  ;;  %v1095_v6 = vld [vmem:[#allocation2 + $0xc8] sm:$0xff]   ;;  %v1098_v9 = vld [vmem:[#allocation2 + $0x10] sm:$0xff]  }
  0x15   :  { %v1092_v3 = vld [vmem:[#allocation2 + $0x80] sm:$0xff]   ;;  %974 = vmatprep.subr.bf16.mxu1 %v1091_v2  ;;  %954 = vmatprep.subr.bf16.mxu0 %v1093_v4  ;;  %v1096_v7 = vld [vmem:[#allocation2 + $0x88] sm:$0xff]   ;;  %v1099_v10 = vld [vmem:[#allocation2 + $0xd0] sm:$0xff]  }
  0x16   :  { %975 = vmatpush3.bf16.msra.mxu1 %v1092_v3  ;;  %v1100_v11 = vld [vmem:[#allocation2 + $0x90] sm:$0xff]   ;;  %v1101_v12 = vld [vmem:[#allocation2 + $0x58] sm:$0xff]   ;;  %v1105_v16 = vld [vmem:[#allocation2 + $0x60] sm:$0xff]  }
  0x17   :  { %976 = vmatprep.subr.bf16.mxu1 %v1095_v6  ;;  %v1102_v13 = vld [vmem:[#allocation2 + $0x18] sm:$0xff]   ;;  %v1106_v17 = vld [vmem:[#allocation2 + $0x20] sm:$0xff]   ;;  %v1109_v20 = vld [vmem:[#allocation2 + $0x68] sm:$0xff]  }
  0x18   :  { %955 = vmatpush3.bf16.msra.mxu0 %v1094_v5  ;;  %v1103_v14 = vld [vmem:[#allocation2 + $0xd8] sm:$0xff]   ;;  %v1107_v18 = vld [vmem:[#allocation2 + $0xe0] sm:$0xff]   ;;  %v1110_v21 = vld [vmem:[#allocation2 + $0x28] sm:$0xff]  }
  0x19   :  { %956 = vmatprep.subr.bf16.mxu0 %v1097_v8  ;;  %v1104_v15 = vld [vmem:[#allocation2 + $0x98] sm:$0xff]   ;;  %v1108_v19 = vld [vmem:[#allocation2 + $0xa0] sm:$0xff]   ;;  %v1111_v22 = vld [vmem:[#allocation2 + $0xe8] sm:$0xff]  }
  0x1a   :  { %977 = vmatpush3.bf16.msra.mxu1 %v1096_v7  ;;  %v1112_v23 = vld [vmem:[#allocation2 + $0xa8] sm:$0xff]   ;;  %v1113_v24 = vld [vmem:[#allocation2 + $0x70] sm:$0xff]   ;;  %v1117_v28 = vld [vmem:[#allocation2 + $0x78] sm:$0xff]  }
  0x1b   :  { %978 = vmatprep.subr.bf16.mxu1 %v1099_v10  ;;  %v1114_v25 = vld [vmem:[#allocation2 + $0x30] sm:$0xff]   ;;  %v1118_v29 = vld [vmem:[#allocation2 + $0x38] sm:$0xff]   ;;  %v42_v31 = vld [vmem:[%s1360_s0 + $0x8] sm:$0xff] }
  0x1c   :  { %957 = vmatpush3.bf16.msra.mxu0 %v1098_v9  ;;  %v1115_v26 = vld [vmem:[#allocation2 + $0xf0] sm:$0xff]   ;;  %v1119_v30 = vld [vmem:[#allocation2 + $0xf8] sm:$0xff]   ;;  %v49_v32 = vld [vmem:[%s1360_s0 + $0x40] sm:$0xff] }
  0x1d   :  { %958 = vmatprep.subr.bf16.mxu0 %v1101_v12  ;;  %v1116_v27 = vld [vmem:[#allocation2 + $0xb0] sm:$0xff]   ;;  %v56_v33 = vpack.c.bf16 %v49_v32, %v42_v31  ;;  %v1120_v34 = vld [vmem:[#allocation2 + $0xb8] sm:$0xff]   ;;  %v41_v35 = vld [vmem:[%s1360_s0] sm:$0xff] }
  0x1e   :  { %979 = vmatpush3.bf16.msra.mxu1 %v1100_v11  ;;  %v48_v36 = vld [vmem:[%s1360_s0 + $0x38] sm:$0xff]  ;;  %v1121_v38 = vld [vmem:[#allocation2 + $0x140] sm:$0xff]   ;;  %v51_v40 = vld [vmem:[%s1360_s0 + $0x50] sm:$0xff] }
  0x1f   :  { %980 = vmatprep.subr.bf16.mxu1 %v1103_v14  ;;  %497 = vmatprep.mubr.bf16.mxu0 %v56_v33  ;;  %v55_v37 = vpack.c.bf16 %v48_v36, %v41_v35  ;;  %v44_v39 = vld [vmem:[%s1360_s0 + $0x18] sm:$0xff]  ;;  %v1122_v42 = vld [vmem:[#allocation2 + $0x100] sm:$0xff]   ;;  %v43_v44 = vld [vmem:[%s1360_s0 + $0x10] sm:$0xff] }
  0x20   :  { %959 = vmatpush3.bf16.msra.mxu0 %v1102_v13  ;;  %v58_v41 = vpack.c.bf16 %v51_v40, %v44_v39  ;;  %v50_v45 = vld [vmem:[%s1360_s0 + $0x48] sm:$0xff]  ;;  %v1125_v49 = vld [vmem:[#allocation2 + $0x150] sm:$0xff]   ;;  %v1127_v51 = vld [vmem:[#allocation2 + $0x158] sm:$0xff]  }
  0x21   :  { %960 = vmatprep.subr.bf16.mxu0 %v1105_v16  ;;  %v57_v46 = vpack.c.bf16 %v50_v45, %v43_v44  ;;  %v1123_v47 = vld [vmem:[#allocation2 + $0x148] sm:$0xff]   ;;  %v1126_v50 = vld [vmem:[#allocation2 + $0x110] sm:$0xff]   ;;  %v1128_v52 = vld [vmem:[#allocation2 + $0x118] sm:$0xff]  }
  0x22   :  { %981 = vmatpush3.bf16.msra.mxu1 %v1104_v15  ;;  %538 = vmatprep.mubr.bf16.mxu1 %v58_v41  ;;  %v1124_v48 = vld [vmem:[#allocation2 + $0x108] sm:$0xff]   ;;  %v1129_v53 = vld [vmem:[#allocation2 + $0x160] sm:$0xff]   ;;  %v1133_v59 = vld [vmem:[#allocation2 + $0x170] sm:$0xff]  }
  0x23   :  { %982 = vmatprep.subr.bf16.mxu1 %v1107_v18  ;;  %v1130_v54 = vld [vmem:[#allocation2 + $0x120] sm:$0xff]   ;;  %v1131_v55 = vld [vmem:[#allocation2 + $0x168] sm:$0xff]   ;;  %v47_v62 = vld [vmem:[%s1360_s0 + $0x30] sm:$0xff] }
  0x24   :  { %961 = vmatpush3.bf16.msra.mxu0 %v1106_v17  ;;  %v1137_v56 = vld [vmem:[#allocation2 + $0x180] sm:$0xff]   ;;  %v46_v57 = vld [vmem:[%s1360_s0 + $0x28] sm:$0xff]  ;;  %v1134_v1 = vld [vmem:[#allocation2 + $0x130] sm:$0xff]  }
  0x25   :  { %962 = vmatprep.subr.bf16.mxu0 %v1109_v20  ;;  %v1132_v58 = vld [vmem:[#allocation2 + $0x128] sm:$0xff]   ;;  %v53_v60 = vld [vmem:[%s1360_s0 + $0x60] sm:$0xff]  ;;  %v1135_v2 = vld [vmem:[#allocation2 + $0x178] sm:$0xff]  }
  0x26   :  { %983 = vmatpush3.bf16.msra.mxu1 %v1108_v19  ;;  %v60_v61 = vpack.c.bf16 %v53_v60, %v46_v57  ;;  %v54_v63 = vld [vmem:[%s1360_s0 + $0x68] sm:$0xff]  ;;  %v1136_v3 = vld [vmem:[#allocation2 + $0x138] sm:$0xff]   ;;  %v45_v4 = vld [vmem:[%s1360_s0 + $0x20] sm:$0xff] }
  0x27   :  { %984 = vmatprep.subr.bf16.mxu1 %v1111_v22  ;;  %v61_v0 = vpack.c.bf16 %v54_v63, %v47_v62  ;;  %v52_v5 = vld [vmem:[%s1360_s0 + $0x58] sm:$0xff]  ;;  %v1138_v7 = vld [vmem:[%s1363_s3] sm:$0xff]   ;;  %v1139_v8 = vld [vmem:[%s1363_s3 + $0x8] sm:$0xff]  }
  0x28   :  { %963 = vmatpush3.bf16.msra.mxu0 %v1110_v21  ;;  %v59_v6 = vpack.c.bf16 %v52_v5, %v45_v4  ;;  %v1140_v9 = vld [vmem:[%s1363_s3 + $0x10] sm:$0xff]   ;;  %v1141_v10 = vld [vmem:[%s1363_s3 + $0x18] sm:$0xff]   ;;  %v1142_v11 = vld [vmem:[%s1363_s3 + $0x20] sm:$0xff]  }
  0x29   :  { %964 = vmatprep.subr.bf16.mxu0 %v1113_v24  ;;  %v1143_v12 = vld [vmem:[%s1363_s3 + $0x28] sm:$0xff]   ;;  %v1144_v13 = vld [vmem:[%s1363_s3 + $0x30] sm:$0xff]   ;;  %v1145_v14 = vld [vmem:[%s1363_s3 + $0x38] sm:$0xff]  }
  0x2a   :  { %985 = vmatpush3.bf16.msra.mxu1 %v1112_v23  ;;  %v1146_v15 = vld [vmem:[%s1365_s5] sm:$0xff]   ;;  %v1147_v16 = vld [vmem:[%s1365_s5 + $0x8] sm:$0xff]   ;;  %v1148_v17 = vld [vmem:[%s1365_s5 + $0x10] sm:$0xff]  }
  0x2b   :  { %986 = vmatprep.subr.bf16.mxu1 %v1115_v26  ;;  %v1149_v18 = vld [vmem:[%s1365_s5 + $0x18] sm:$0xff]   ;;  %v1150_v19 = vld [vmem:[%s1365_s5 + $0x20] sm:$0xff]   ;;  %v1151_v20 = vld [vmem:[%s1365_s5 + $0x28] sm:$0xff]  }
  0x2c   :  { %965 = vmatpush3.bf16.msra.mxu0 %v1114_v25  ;;  %v874_v22 = vld [vmem:[%s1362_s2] ss:$0 sm:$0xff]  ;;  %v1153_v57 = vld [vmem:[%s1365_s5 + $0x38] sm:$0xff]  }
  0x2d   :  { %966 = vmatprep.subr.bf16.mxu0 %v1117_v28 }
  0x2e   :  { %987 = vmatpush3.bf16.msra.mxu1 %v1116_v27 }
  0x2f   :  { %988 = vmatprep.subr.bf16.mxu1 %v1119_v30 }
  0x30   :  { %967 = vmatpush3.bf16.msra.mxu0 %v1118_v29 }
  0x31   :  { %996 = vmatprep.subr.bf16.mxu0 %v1121_v38 }
  0x32   :  { %989 = vmatpush3.bf16.msra.mxu1 %v1120_v34 }
  0x33   :  { %1038 = vmatprep.subr.bf16.mxu1 %v1181_v43  ;;  %498 = vmatmul.mubr.bf16.vlgmr.msra.gmra.mrb[0].mxu0 %v55_v37 }
  0x34   :  { %997 = vmatpush3.bf16.msra.mxu0 %v1122_v42  ;;  %579 = vmatprep.mubr.bf16.mxu0 %v60_v61 }
  0x35   :  { %539 = vmatmul.mubr.bf16.vlgmr.msra.gmra.mrb[0].mxu1 %v57_v46  ;;  %998 = vmatprep.subr.bf16.mxu0 %v1123_v47 }
  0x36   :  { %1040 = vmatprep.mubr.msk.bf16.mxu1 %vm1182_vm0, %v1181_v43  ;;  %1039 = vmatpush3.bf16.msra.mxu1 %v1137_v56  ;;  %v1152_v56 = vld [vmem:[%s1365_s5 + $0x30] sm:$0xff]  }
  0x37   :  { %1044 = vmatprep.subr.bf16.mxu1 %v1181_v43 }
  0x38   :  { %999 = vmatpush3.bf16.msra.mxu0 %v1124_v48 }
  0x39   :  { %1000 = vmatprep.subr.bf16.mxu0 %v1125_v49 }
  0x3c   :  { %1001 = vmatpush3.bf16.msra.mxu0 %v1126_v50 }
  0x3d   :  { %1002 = vmatprep.subr.bf16.mxu0 %v1127_v51  ;;  %1041 = vmatmul.mubr.msk.bf16.vlgmr.msra.gmra.mrb[4].mxu1 %vm461_vm1, %v61_v0 }
  0x3e   :  { %1060 = vmatprep.mubr.msk.bf16.mxu1 %vm1182_vm0, %v1181_v43  ;;  %1045 = vmatpush3.bf16.msra.mxu1 %v1138_v7 }
  0x3f   :  { %1046 = vmatprep.subr.bf16.mxu1 %v1181_v43 }
  0x40   :  { %1003 = vmatpush3.bf16.msra.mxu0 %v1128_v52 }
  0x41   :  { %1004 = vmatprep.subr.bf16.mxu0 %v1129_v53 }
  0x42   :  { %1047 = vmatpush3.bf16.msra.mxu1 %v1139_v8 }
  0x43   :  { %1048 = vmatprep.subr.bf16.mxu1 %v1181_v43 }
  0x44   :  { %1005 = vmatpush3.bf16.msra.mxu0 %v1130_v54 }
  0x45   :  { %1006 = vmatprep.subr.bf16.mxu0 %v1131_v55 }
  0x46   :  { %1049 = vmatpush3.bf16.msra.mxu1 %v1140_v9 }
  0x47   :  { %1050 = vmatprep.subr.bf16.mxu1 %v1181_v43 }
  0x48   :  { %1007 = vmatpush3.bf16.msra.mxu0 %v1132_v58  ;;  %v925_v58 = vld [vmem:[%s1364_s4] ss:$0 sm:$0xff] }
  0x49   :  { %1008 = vmatprep.subr.bf16.mxu0 %v1133_v59 }
  0x4a   :  { %1051 = vmatpush3.bf16.msra.mxu1 %v1141_v10 }
  0x4b   :  { %1052 = vmatprep.subr.bf16.mxu1 %v1181_v43 }
  0x4c   :  { %1009 = vmatpush3.bf16.msra.mxu0 %v1134_v1 }
  0x4d   :  { %1010 = vmatprep.subr.bf16.mxu0 %v1135_v2 }
  0x4e   :  { %1053 = vmatpush3.bf16.msra.mxu1 %v1142_v11 }
  0x4f   :  { %1054 = vmatprep.subr.bf16.mxu1 %v1181_v43 }
  0x50   :  { %1011 = vmatpush3.bf16.msra.mxu0 %v1136_v3 }
  0x51   :  { %1064 = vmatprep.subr.bf16.mxu0 %v1181_v43 }
  0x52   :  { %1055 = vmatpush3.bf16.msra.mxu1 %v1143_v12 }
  0x53   :  { %580 = vmatmul.mubr.bf16.vlgmr.msra.gmra.mrb[4].mxu0 %v59_v6  ;;  %1056 = vmatprep.subr.bf16.mxu1 %v1181_v43 }
  0x54   :  { %1080 = vmatprep.mubr.msk.bf16.mxu0 %vm1182_vm0, %v1181_v43  ;;  %1065 = vmatpush3.bf16.msra.mxu0 %v1146_v15 }
  0x55   :  { %1066 = vmatprep.subr.bf16.mxu0 %v1181_v43 }
  0x56   :  { %1057 = vmatpush3.bf16.msra.mxu1 %v1144_v13 }
  0x57   :  { %1058 = vmatprep.subr.bf16.mxu1 %v1181_v43 }
  0x58   :  { %1067 = vmatpush3.bf16.msra.mxu0 %v1147_v16 }
  0x59   :  { %1068 = vmatprep.subr.bf16.mxu0 %v1181_v43 }
  0x5a   :  { %1059 = vmatpush3.bf16.msra.mxu1 %v1145_v14 }
  0x5c   :  { %1069 = vmatpush3.bf16.msra.mxu0 %v1148_v17 }
  0x5d   :  { %1070 = vmatprep.subr.bf16.mxu0 %v1181_v43 }
  0x60   :  { %1071 = vmatpush3.bf16.msra.mxu0 %v1149_v18 }
  0x61   :  { %1072 = vmatprep.subr.bf16.mxu0 %v1181_v43 }
  0x64   :  { %1073 = vmatpush3.bf16.msra.mxu0 %v1150_v19 }
  0x65   :  { %1074 = vmatprep.subr.bf16.mxu0 %v1181_v43 }
  0x68   :  { %1075 = vmatpush3.bf16.msra.mxu0 %v1151_v20 }
  0x69   :  { %1076 = vmatprep.subr.bf16.mxu0 %v1181_v43 }
  0x6c   :  { %1077 = vmatpush3.bf16.msra.mxu0 %v1152_v56 }
  0x6d   :  { %1078 = vmatprep.subr.bf16.mxu0 %v1181_v43  ;;  %v934_v43 = vld [vmem:[%s1366_s6] ss:$0 sm:$0xff] }
  0x70   :  { %1079 = vmatpush3.bf16.msra.mxu0 %v1153_v57 }
 0x106   :  { %v968_v21 = vpop.f32.mrb[0].mxu0 }
 0x107   :  { %v969_v23 = vpop.f32.mrb[1].mxu0 }
 0x108   :  { %v970_v24 = vadd.f32 %v969_v23, %v968_v21  ;;  %v971_v25 = vpop.f32.mrb[2].mxu0  ;;  %v990_v26 = vpop.f32.mrb[0].mxu1 }
 0x109   :  { %v972_v27 = vpop.f32.mrb[3].mxu0  ;;  %v991_v30 = vpop.f32.mrb[1].mxu1 }
 0x10a   :  { %v500_v28 = vadd.f32 %v970_v24, %v874_v22  ;;  %v973_v29 = vadd.f32 %v972_v27, %v971_v25  ;;  %v992_v31 = vadd.f32 %v991_v30, %v990_v26  ;;  %v993_v32 = vpop.f32.mrb[2].mxu1 }
 0x10b   :  { %v994_v34 = vpop.f32.mrb[3].mxu1 }
 0x10c   :  { %v503_v33 = vadd.f32 %v973_v29, %v874_v22  ;;  %v541_v35 = vadd.f32 %v992_v31, %v500_v28  ;;  %v995_v36 = vadd.f32 %v994_v34, %v993_v32 }
 0x10e   :  { %v544_v37 = vadd.f32 %v995_v36, %v503_v33 }
 0x110   :  { %v622_v38 = vpop.f32.mrb[4].mxu1 }
 0x111   :  { %v1042_v39 = vpop.f32.mrb[5].mxu1 }
 0x112   :  { %v625_v40 = vpop.f32.mrb[6].mxu1 }
 0x113   :  { %v1043_v41 = vpop.f32.mrb[7].mxu1 }
 0x126   :  { %v1012_v42 = vpop.f32.mrb[4].mxu0 }
 0x127   :  { %v1013_v44 = vpop.f32.mrb[5].mxu0 }
 0x128   :  { %v1014_v45 = vadd.f32 %v1013_v44, %v1012_v42  ;;  %v1015_v46 = vpop.f32.mrb[6].mxu0 }
 0x129   :  { %v1016_v47 = vpop.f32.mrb[7].mxu0 }
 0x12a   :  { %v582_v48 = vadd.f32 %v1014_v45, %v541_v35  ;;  %v1017_v49 = vadd.f32 %v1016_v47, %v1015_v46 }
 0x12c   :  { %v623_v50 = vadd.f32 %v622_v38, %v582_v48  ;;  %v585_v51 = vadd.f32 %v1017_v49, %v544_v37 }
 0x12e   :  { %v626_v52 = vadd.f32 %v625_v40, %v585_v51  ;;  %v629_v53 = vmax.f32 %v623_v50, 0.0 }
 0x130   :  { %v630_v54 = vmax.f32 %v626_v52, 0.0 }
 0x132   :  { %v631_v55 = vpack.c.bf16 %v630_v54, %v629_v53 }
 0x134   :  { %1061 = vmatmul.mubr.bf16.vlgmr.msra.gmra.mrb[8].mxu1 %v631_v55 }
 0x207   :  { %v737_v59 = vpop.f32.mrb[8].mxu1 }
 0x208   :  { %v738_v60 = vadd.f32 %v925_v58, %v737_v59  ;;  %v1062_v61 = vpop.f32.mrb[9].mxu1 }
 0x209   :  { %v740_v62 = vpop.f32.mrb[10].mxu1 }
 0x20a   :  { %v741_v63 = vadd.f32 %v925_v58, %v740_v62  ;;  %v1063_v0 = vpop.f32.mrb[11].mxu1  ;;  %v744_v1 = vmax.f32 %v738_v60, 0.0 }
 0x20c   :  { %v745_v2 = vmax.f32 %v741_v63, 0.0 }
 0x20e   :  { %v746_v3 = vpack.c.bf16 %v745_v2, %v744_v1 }
 0x210   :  { %1081 = vmatmul.mubr.bf16.vlgmr.msra.gmra.mrb[8].mxu0 %v746_v3 }
 0x2e3   :  { %v852_v4 = vpop.f32.mrb[8].mxu0 }
 0x2e4   :  { %v1082_v5 = vpop.f32.mrb[9].mxu0  ;;  %v853_v7 = vadd.f32 %v934_v43, %v852_v4 }
 0x2e5   :  { %v855_v6 = vpop.f32.mrb[10].mxu0 }
 0x2e6   :  { %v856_v8 = vadd.f32 %v934_v43, %v855_v6  ;;  %v1083_v9 = vpop.f32.mrb[11].mxu0 }
 0x2e8   :  { %v950_v10 = vpack.c.bf16 %v856_v8, %v853_v7 }
 0x2ea   :  { %951 = vst [vmem:[%s1367_s7] sm:$0xff] %v950_v10  }
 0x2eb   :  { %873 = vsyncpa [#allocation3], 1 }

</bundles_post_ra>
